<compile_context>
chip_gen: v5e
topology: v5e:2x2
jax: 0.10.0
libtpu: 0.0.40
codegen_flags: <defaults>
</compile_context>

<pallas_src>
import functools

import jax
import jax.numpy as jnp
from jax import lax
from jax.experimental import pallas as pl
from jax.experimental.pallas import tpu as pltpu


# ------------------------------ Pallas kernel -------------------------------

def _ce_loss_kernel(x_ref, lab_ref, loss_ref, *, num_classes):
    # x_ref / lab_ref blocks: (1, C, TM); loss_ref block: (1, 1, TM).
    x = x_ref[0].astype(jnp.float32)           # (C, TM) logits
    lab = lab_ref[0].astype(jnp.int32)         # (C, TM); mimics label.long()

    # target = argmax over channels of the integer-cast label (first maximum).
    ch = lax.broadcasted_iota(jnp.int32, lab.shape, 0)          # channel index
    lab_max = jnp.max(lab, axis=0, keepdims=True)               # (1, TM)
    tgt = jnp.min(jnp.where(lab == lab_max, ch, num_classes),
                  axis=0, keepdims=True)                        # (1, TM)
    onehot = ch == tgt                                          # (C, TM)

    # per-pixel NLL of log_softmax: logsumexp(x) - x[target], all in f32.
    m = jnp.max(x, axis=0, keepdims=True)                       # (1, TM)
    lse = jnp.log(jnp.sum(jnp.exp(x - m), axis=0, keepdims=True)) + m
    x_t = jnp.sum(jnp.where(onehot, x, 0.0), axis=0, keepdims=True)
    loss_ref[0] = lse - x_t                                     # (1, TM) f32


# -------------------------------- wrapper ------------------------------------

def _pick_tile(hw, cap=8192):
    """Largest 128-multiple divisor of hw that is <= cap; else the full extent
    (a full-extent block is always a legal BlockSpec)."""
    if hw % 128 != 0 or hw <= cap:
        return hw
    t = cap - (cap % 128)
    while hw % t != 0:
        t -= 128
    return t


def cross_entropy_loss(output, label):
    """output, label: (N, C, H, W). Returns scalar loss (mean over N*H*W)."""
    N, C, H, W = output.shape
    HW = H * W
    x = output.reshape(N, C, HW)
    lab = label.reshape(N, C, HW)

    tm = _pick_tile(HW)
    grid = (N, HW // tm)

    per_px = pl.pallas_call(
        functools.partial(_ce_loss_kernel, num_classes=C),
        out_shape=jax.ShapeDtypeStruct((N, 1, HW), jnp.float32),
        grid_spec=pltpu.PrefetchScalarGridSpec(
            num_scalar_prefetch=0,
            grid=grid,
            in_specs=[
                pl.BlockSpec((1, C, tm), lambda n, i: (n, 0, i)),
                pl.BlockSpec((1, C, tm), lambda n, i: (n, 0, i)),
            ],
            out_specs=pl.BlockSpec((1, 1, tm), lambda n, i: (n, 0, i)),
        ),
        compiler_params=pltpu.CompilerParams(
            dimension_semantics=("parallel", "parallel")),
    )(x, lab)

    # NLLLoss2d default reduction: mean over all pixels.
    return jnp.mean(per_px)


# ---------------------------------- main -------------------------------------

if __name__ == "__main__":
    key = jax.random.PRNGKey(0)
    k_out, k_cls = jax.random.split(key)

    # Small shapes consistent with the module: batch=2, label_nc=4, 16x16.
    N, label_nc, H, W = 2, 4, 16, 16
    output = jax.random.normal(k_out, (N, label_nc, H, W), jnp.float32)
    cls = jax.random.randint(k_cls, (N, H, W), 0, label_nc)
    # label is a one-hot map over channels, as consumed by the PyTorch module.
    label = jax.nn.one_hot(cls, label_nc, axis=1, dtype=jnp.float32)

    loss = jax.block_until_ready(cross_entropy_loss(output, label))

    # Pure-JAX reference of the PyTorch forward (LogSoftmax + NLLLoss2d).
    tgt = jnp.argmax(label.astype(jnp.int32), axis=1)            # (N, H, W)
    logp = jax.nn.log_softmax(output, axis=1)
    ref = -jnp.mean(jnp.take_along_axis(logp, tgt[:, None, :, :], axis=1))

    assert loss.shape == (), loss.shape
    assert bool(jnp.isfinite(loss))
    assert abs(float(loss) - float(ref)) < 1e-5, (float(loss), float(ref))
    print("KERNEL_OK")
</pallas_src>

<mosaic_0001>
module attributes {stable_mosaic.version = 11 : i64} {
  func.func @_ce_loss_kernel(%arg0: i32, %arg1: i32, %arg2: memref<1x4x256xf32, #tpu.memory_space<vmem>>, %arg3: memref<1x4x256xf32, #tpu.memory_space<vmem>>, %arg4: memref<1x1x256xf32, #tpu.memory_space<vmem>>) attributes {dimension_semantics = [#tpu.dimension_semantics<parallel>, #tpu.dimension_semantics<parallel>], iteration_bounds = array<i64: 2, 1>, scalar_prefetch = 0 : i64, scratch_operands = 0 : i64, tpu.core_type = #tpu.core_type<tc>, window_params = [{transform_indices = @transform_0, window_bounds = array<i64: 1, 4, 256>}, {transform_indices = @transform_1, window_bounds = array<i64: 1, 4, 256>}, {transform_indices = @transform_2, window_bounds = array<i64: 1, 1, 256>}]} {
    %c0 = arith.constant 0 : index
    %c0_0 = arith.constant 0 : index
    %c0_1 = arith.constant 0 : index
    %0 = vector.load %arg2[%c0, %c0_0, %c0_1] : memref<1x4x256xf32, #tpu.memory_space<vmem>>, vector<1x4x256xf32>
    %1 = vector.shape_cast %0 : vector<1x4x256xf32> to vector<4x256xf32>
    %c0_2 = arith.constant 0 : index
    %c0_3 = arith.constant 0 : index
    %c0_4 = arith.constant 0 : index
    %2 = vector.load %arg3[%c0_2, %c0_3, %c0_4] : memref<1x4x256xf32, #tpu.memory_space<vmem>>, vector<1x4x256xf32>
    %3 = vector.shape_cast %2 : vector<1x4x256xf32> to vector<4x256xf32>
    %4 = arith.fptosi %3 : vector<4x256xf32> to vector<4x256xi32>
    %5 = tpu.iota {dimensions = array<i32: 0>} : vector<4x256xi32>
    %cst = arith.constant dense<-2147483648> : vector<256xi32>
    %6 = vector.multi_reduction <maxsi>, %4, %cst [0] : vector<4x256xi32> to vector<256xi32>
    %7 = vector.shape_cast %6 : vector<256xi32> to vector<1x256xi32>
    %8 = vector.broadcast %7 : vector<1x256xi32> to vector<4x256xi32>
    %9 = arith.cmpi eq, %4, %8 : vector<4x256xi32>
    %c4_i32 = arith.constant 4 : i32
    %10 = vector.broadcast %c4_i32 : i32 to vector<4x256xi32>
    %11 = arith.select %9, %5, %10 : vector<4x256xi1>, vector<4x256xi32>
    %cst_5 = arith.constant dense<2147483647> : vector<256xi32>
    %12 = vector.multi_reduction <minsi>, %11, %cst_5 [0] : vector<4x256xi32> to vector<256xi32>
    %13 = vector.shape_cast %12 : vector<256xi32> to vector<1x256xi32>
    %14 = vector.broadcast %13 : vector<1x256xi32> to vector<4x256xi32>
    %15 = arith.cmpi eq, %5, %14 : vector<4x256xi32>
    %cst_6 = arith.constant dense<0xFF800000> : vector<256xf32>
    %16 = vector.multi_reduction <maximumf>, %1, %cst_6 [0] : vector<4x256xf32> to vector<256xf32>
    %17 = vector.shape_cast %16 : vector<256xf32> to vector<1x256xf32>
    %18 = vector.broadcast %17 : vector<1x256xf32> to vector<4x256xf32>
    %19 = arith.subf %1, %18 : vector<4x256xf32>
    %20 = math.exp %19 : vector<4x256xf32>
    %cst_7 = arith.constant dense<0.000000e+00> : vector<256xf32>
    %21 = vector.multi_reduction <add>, %20, %cst_7 [0] : vector<4x256xf32> to vector<256xf32>
    %22 = vector.shape_cast %21 : vector<256xf32> to vector<1x256xf32>
    %23 = math.log %22 : vector<1x256xf32>
    %24 = arith.addf %23, %17 : vector<1x256xf32>
    %cst_8 = arith.constant 0.000000e+00 : f32
    %25 = vector.broadcast %cst_8 : f32 to vector<4x256xf32>
    %26 = arith.select %15, %1, %25 : vector<4x256xi1>, vector<4x256xf32>
    %cst_9 = arith.constant dense<0.000000e+00> : vector<256xf32>
    %27 = vector.multi_reduction <add>, %26, %cst_9 [0] : vector<4x256xf32> to vector<256xf32>
    %28 = vector.shape_cast %27 : vector<256xf32> to vector<1x256xf32>
    %29 = arith.subf %24, %28 : vector<1x256xf32>
    %c0_10 = arith.constant 0 : index
    %c0_11 = arith.constant 0 : index
    %c0_12 = arith.constant 0 : index
    %30 = vector.load %arg4[%c0_10, %c0_11, %c0_12] : memref<1x1x256xf32, #tpu.memory_space<vmem>>, vector<1x1x256xf32>
    %31 = vector.shape_cast %30 : vector<1x1x256xf32> to vector<1x256xf32>
    %32 = vector.shape_cast %29 : vector<1x256xf32> to vector<1x1x256xf32>
    tpu.vector_store %arg4[%c0_10, %c0_11, %c0_12], %32 {strides = array<i32>} : memref<1x1x256xf32, #tpu.memory_space<vmem>>, vector<1x1x256xf32>,
    return
  }
  func.func @transform_0(%arg0: i32, %arg1: i32) -> (i32, i32, i32) {
    %c0_i32 = arith.constant 0 : i32
    %c0_i32_0 = arith.constant 0 : i32
    return %arg0, %c0_i32, %arg1 : i32, i32, i32
  }
  func.func @transform_1(%arg0: i32, %arg1: i32) -> (i32, i32, i32) {
    %c0_i32 = arith.constant 0 : i32
    %c0_i32_0 = arith.constant 0 : i32
    return %arg0, %c0_i32, %arg1 : i32, i32, i32
  }
  func.func @transform_2(%arg0: i32, %arg1: i32) -> (i32, i32, i32) {
    %c0_i32 = arith.constant 0 : i32
    %c0_i32_0 = arith.constant 0 : i32
    return %arg0, %c0_i32, %arg1 : i32, i32, i32
  }
}

</mosaic_0001>

<bundles_post_ra>
// kernel: tpu_custom_call.1
= control target key start
LH: loop header
LB: loop body
LE: loop exit
PB: predicated region body
PF: predicated region fallthrough
CT: control target
= control target key end

     0   :  { %7 = vsyncpa [#allocation3], 0  ;;  %s926_s0 = inlined_call_operand.hbm [shape: f32[2,4,256], index: 0, kind: input, shape index: {}]   ;;  %s927_s1 = inlined_call_operand.hbm [shape: f32[2,4,256], index: 1, kind: input, shape index: {}]   ;;  %s928_s2 = inlined_call_operand.hbm [shape: f32[2,1,256], index: 2, kind: output, shape index: {}]  }
   0x1   :  { %9 = vsyncpa [#allocation3 + $0x1], 0 }
   0x2   :  { %10 = vsyncpa [#allocation6], 0 }
   0x3   :  { %12 = vsyncpa [#allocation6 + $0x1], 0 }
   0x4   :  { %13 = vsyncpa [#allocation4], 0 }
   0x5   :  { %15 = vsyncpa [#allocation4 + $0x1], 0  ;;  %s767_s9 = smov 0   ;;  %s769_s10 = smov 0  }
   0x6   :  { %s771_s11 = smov 0   ;;  %s773_s12 = smov 0  }
   0x7   :  { %s775_s13 = smov 0   ;;  %s777_s14 = smov 0  }
   0x8 LB: > { %s504_s15 = sadd.s32 4294967295, %s749_s14   ;;  %s505_s16 = sadd.s32 4294967294, %s749_s14   ;;  %s749_s14 = sphi %s777_s14, %s21_s14   ;;  %s745_s13 = sphi %s775_s13, %s937_s13   ;;  %s741_s12 = sphi %s773_s12, %s936_s12   ;;  %s737_s11 = sphi %s771_s11, %s935_s11   ;;  %s733_s10 = sphi %s769_s10, %s934_s10   ;;  %s729_s9 = sphi %s767_s9, %s933_s9  }
   0x9   : > { %s33_s17 = sadd.s32 1, %s745_s13  ;;  %s42_s18 = sadd.s32 1, %s737_s11 }
   0xa   : > { %p35_p0 = scmp.ge.s32.totalorder %s33_s17, 2  ;;  %p49_p1 = scmp.ne.s32.totalorder %s737_s11, %s733_s10 }
   0xb   : > { %p50_p2 = scmp.eq.s32.totalorder %s749_s14, 0  ;;  %p55_p3 = scmp.ne.s32.totalorder %s733_s10, %s729_s9 }
   0xc   : > { %s939_s17 = smov (%p35_p0, %s33_s17), 0  ;;  %p56_p5 = scmp.eq.s32.totalorder %s504_s15, 0 }
   0xd   : > { %p808_p4 = por %p50_p2, %p49_p1  ;;  %s37_s20 = ssub.s32 %s745_s13, %s939_s17 }
   0xe   : > { %p109_p6 = scmp.eq.s32.totalorder %s504_s15, 1  ;;  %p40_p7 = scmp.eq.s32.totalorder %s37_s20, 0 }
   0xf   : > { %p814_p8 = por %p56_p5, %p55_p3  ;;  %p115_p10 = scmp.eq.s32.totalorder %s505_s16, 1 }
  0x10   : > { %p818_p9 = por %p109_p6, %p49_p1  ;;  %p507_p12 = scmp.ge.s32.totalorder %s749_s14, 2 }
  0x11   : > { %s823_s23 = scalar_select %p40_p7, %s737_s11, %s42_s18  }
  0x12   : > { %p825_p11 = por %p115_p10, %p55_p3  ;;  %p546_p13 = scmp.lt.s32.totalorder %s749_s14, 2 }
  0x13   : > { %s135_s25 = sand.u32 1, %s737_s11   ;;  %s522_s27 = sshll.u32 %s745_s13, 3 }
  0x14   : > { %s508_s26 = sshll.u32 %s135_s25, 3  ;;  %s146_s30 = scalar_lea.hbm %s926_s0, %s522_s27 }
  0x15   : > { %s139_s3 = scalar_lea.vmem [#allocation2], %s508_s26  ;;  %s148_s5 = sshll.u32 %s146_s30, 4  ;;  %s149_s5 = int_to_ptr.hbm [resolvable:$true] %s148_s5 }
  0x16   : > { %s150_s4 = sshll.u32 %s139_s3, 4  ;;  %p536_p0 = pnand %p546_p13, %p808_p4  ;;  %s151_s4 = int_to_ptr.vmem [resolvable:$true] %s150_s4 }
  0x17   : > { %p514_p1 = scmp.ge.s32.totalorder %s749_s14, 1  ;;  %p177_p2 = scmp.lt.s32.totalorder %s749_s14, 3 }
  0x18   : > { %s136_s6 = scalar_lea.sflag [#allocation3], %s135_s25  ;;  %s168_s15 = scalar_lea.hbm %s927_s1, %s522_s27 }
  0x19   : > { %538 = dma.hbm_to_vmem [thread:$0]  (!%p536_p0), %s149_s5, 128, %s151_s4, %s136_s6  }
  0x1a   : > { %p178_p3 = pnand %p514_p1, %p177_p2  ;;  %s161_s16 = scalar_lea.vmem [#allocation5], %s508_s26 }
  0x1b   : > { %s172_s18 = sshll.u32 %s161_s16, 4  ;;  %s170_s20 = sshll.u32 %s168_s15, 4  ;;  %s173_s18 = int_to_ptr.vmem [resolvable:$true] %s172_s18  ;;  %s171_s20 = int_to_ptr.hbm [resolvable:$true] %s170_s20 }
  0x1c   : > { %s158_s28 = scalar_lea.sflag [#allocation6], %s135_s25  ;;  %181 = sbr.rel (%p178_p3) target bundleno = 152 (0x98), region = 28 }
  0x1d   : > { %541 = dma.hbm_to_vmem [thread:$0]  (!%p536_p0), %s171_s20, 128, %s173_s18, %s158_s28  }
  0x1e   : > { %s844_s19 = sand.u32 (!%p178_p3), 1, %s733_s10  }
  0x1f   : > { %s515_s29 = sshll.u32 (!%p178_p3), %s844_s19, 3  ;;  %s184_s30 = scalar_lea.sflag (!%p178_p3), [#allocation3], %s844_s19 }
  0x20   : > { %s848_s3 = scalar_lea.vmem (!%p178_p3), [#allocation2], %s515_s29 }
  0x21   : > { %716 = dma.done.wait (%p814_p8), %s184_s30, 128  }
  0x22   : > { %718 = vsyncadd (%p814_p8), %s184_s30, 4294967168  ;;  %s194_s25 = scalar_lea.sflag [#allocation6], %s844_s19  ;;  %s197_s26 = scalar_lea.vmem [#allocation5], %s515_s29 }
  0x23   : > { %720 = dma.done.wait (%p814_p8), %s194_s25, 128  }
  0x24   : > { %722 = vsyncadd (%p814_p8), %s194_s25, 4294967168  ;;  %v228_v0 = vld [vmem:[%s197_s26] sm:$0xff]  ;;  %vm235_vm1 = vcmask 1043456   ;;  %v230_v13 = vlaneseq  ;;  %v751_v16 = vmov 839922192   ;;  %v227_v30 = vld [vmem:[%s848_s3] sm:$0xff] }
  0x25   : > { %vm524_vm0 = vcmp.lt.s32.totalorder %v228_v0, 0  ;;  %v525_v1 = vceil.f32 %v228_v0  ;;  %v526_v2 = vfloor.f32 %v228_v0  ;;  %v260_v17 = vunpack.c.l.s4 %v751_v16  ;;  %s517_s21 = sshll.u32 %s844_s19, 1  ;;  %s519_s27 = sshll.u32 %s741_s12, 1 }
  0x26   : > { %v862_v20 = vshrl.u32 %v230_v13, 7  ;;  %s390_s6 = scalar_lea.hbm %s928_s2, %s519_s27  ;;  %s223_s7 = scalar_lea.vmem [#allocation7], %s517_s21 }
  0x27   : > { %v527_v3 = vsel %vm524_vm0, %v525_v1, %v526_v2  ;;  %v261_v23 = vunpack.c.0.s8 %v260_v17  ;;  %s392_s8 = sshll.u32 %s223_s7, 4  ;;  %s394_s12 = sshll.u32 %s390_s6, 4  ;;  %s393_s8 = int_to_ptr.vmem [resolvable:$true] %s392_s8  ;;  %s395_s12 = int_to_ptr.hbm [resolvable:$true] %s394_s12 }
  0x28   : > { %v528_v4 = vcvt.f32.s32 %v527_v3  ;;  %s378_s15 = scalar_lea.sflag [#allocation4], %s844_s19  ;;  %s677_s16 = sshra.s32 %s395_s12, 4  ;;  %s678_s16 = int_to_ptr.hbm [resolvable:$true] %s677_s16 }
  0x29   : > { %v262_v26 = vperm.slane %v862_v20, %v261_v23  ;;  %s679_s18 = scalar_lea.hbm %s678_s16, 2  ;;  %s683_s29 = scalar_lea.hbm %s928_s2, 4 }
  0x2a   : > { %232 = vst [vmem:[#allocation1] ss:$2 sm:$0xff] %v528_v4  ;;  %p680_p4 = scmp.ne.s32.totalorder %s678_s16, %s679_s18  ;;  %p684_p7 = scmp.lt.s32.totalorder %s678_s16, %s928_s2 }
  0x2b   : > { %p685_p8 = scmp.lt.s32.totalorder %s683_s29, %s679_s18 }
  0x2c   : > { %p681_p5 = pnand %p680_p4, %p818_p9 }
  0x2d   : > { %p686_p10 = por %p685_p8, %p684_p7 }
  0x2e   : > { %p682_p6 = pneg %p681_p5 }
  0x30   : > { %p687_p13 = pnand %p686_p10, %p682_p6 }
  0x31   : > { %v233_v5 = vld.sshfl [vmem:[#allocation1] sm:$0xff pattern:$0x75316420]  ;;  %v234_v6 = vld.sshfl [vmem:[#allocation1 + $0x8] sm:$0xff pattern:$0x75316420] }
  0x32   : > { %v236_v7 = vsel %vm235_vm1, %v233_v5, 2147483648  ;;  %v246_v8 = vsel %vm235_vm1, %v234_v6, 2147483648 }
  0x33   : > { %v237_v9 = vrot.slane %v236_v7, 4  ;;  %v247_v10 = vrot.slane %v246_v8, 4 }
  0x35   : > { %vm238_vm2 = vcmp.gt.s32.totalorder %v236_v7, %v237_v9  ;;  %vm248_vm3 = vcmp.gt.s32.totalorder %v246_v8, %v247_v10 }
  0x36   : > { %v239_v11 = vsel %vm238_vm2, %v236_v7, %v237_v9  ;;  %v249_v12 = vsel %vm248_vm3, %v246_v8, %v247_v10  ;;  %vm374_vm2 = vcmp.lt.s32.totalorder %v230_v13, 256 }
  0x37   : > { %v240_v14 = vrot.slane %v239_v11, 2  ;;  %v250_v15 = vrot.slane %v249_v12, 2 }
  0x39   : > { %vm241_vm4 = vcmp.gt.s32.totalorder %v239_v11, %v240_v14  ;;  %vm251_vm5 = vcmp.gt.s32.totalorder %v249_v12, %v250_v15 }
  0x3a   : > { %v242_v18 = vsel %vm241_vm4, %v239_v11, %v240_v14  ;;  %v252_v19 = vsel %vm251_vm5, %v249_v12, %v250_v15 }
  0x3b   : > { %v243_v21 = vrot.slane %v242_v18, 1  ;;  %v253_v22 = vrot.slane %v252_v19, 1 }
  0x3d   : > { %vm244_vm6 = vcmp.gt.s32.totalorder %v242_v18, %v243_v21  ;;  %vm254_vm7 = vcmp.gt.s32.totalorder %v252_v19, %v253_v22 }
  0x3e   : > { %v255_v24 = vsel %vm254_vm7, %v252_v19, %v253_v22  ;;  %v245_v27 = vsel %vm244_vm6, %v242_v18, %v243_v21 }
  0x3f   : > { %v256_v25 = vrot.slane %v255_v24, 4 }
  0x41   : > { %v257_v28 = vsel %vm235_vm1, %v245_v27, %v256_v25 }
  0x42   : > { %vm258_vm8 = vcmp.eq.s32.totalorder %v528_v4, %v257_v28 }
  0x43   : > { %v263_v29 = vsel %vm258_vm8, %v262_v26, 4 }
  0x44   : > { %264 = vst [vmem:[#allocation1] ss:$2 sm:$0xff] %v263_v29 }
  0x4b   : > { %v265_v31 = vld.sshfl [vmem:[#allocation1] sm:$0xff pattern:$0x75316420]  ;;  %v266_v32 = vld.sshfl [vmem:[#allocation1 + $0x8] sm:$0xff pattern:$0x75316420] }
  0x4c   : > { %290 = vst [vmem:[#allocation1] ss:$2 sm:$0xff] %v227_v30  ;;  %v267_v45 = vsel %vm235_vm1, %v265_v31, 2147483647  ;;  %v277_v46 = vsel %vm235_vm1, %v266_v32, 2147483647 }
  0x4d   : > { %v268_v50 = vrot.slane %v267_v45, 4  ;;  %v278_v51 = vrot.slane %v277_v46, 4 }
  0x4f   : > { %vm269_vm9 = vcmp.lt.s32.totalorder %v267_v45, %v268_v50  ;;  %vm279_vm10 = vcmp.lt.s32.totalorder %v277_v46, %v278_v51 }
  0x50   : > { %v270_v57 = vsel %vm269_vm9, %v267_v45, %v268_v50  ;;  %v280_v58 = vsel %vm279_vm10, %v277_v46, %v278_v51 }
  0x51   : > { %v271_v59 = vrot.slane %v270_v57, 2  ;;  %v281_v60 = vrot.slane %v280_v58, 2 }
  0x53   : > { %v291_v33 = vld.sshfl [vmem:[#allocation1] sm:$0xff pattern:$0x75316420]  ;;  %v292_v34 = vld.sshfl [vmem:[#allocation1 + $0x8] sm:$0xff pattern:$0x75316420]  ;;  %vm272_vm11 = vcmp.lt.s32.totalorder %v270_v57, %v271_v59  ;;  %vm282_vm12 = vcmp.lt.s32.totalorder %v280_v58, %v281_v60 }
  0x54   : > { %v295_v35 = vsel %vm235_vm1, %v291_v33, -inf  ;;  %v302_v36 = vsel %vm235_vm1, %v292_v34, -inf  ;;  %v283_v62 = vsel %vm282_vm12, %v280_v58, %v281_v60  ;;  %v273_v63 = vsel %vm272_vm11, %v270_v57, %v271_v59 }
  0x55   : > { %v296_v37 = vrot.slane %v295_v35, 4  ;;  %v303_v38 = vrot.slane %v302_v36, 4  ;;  %v284_v0 = vrot.slane %v283_v62, 1  ;;  %v274_v1 = vrot.slane %v273_v63, 1 }
  0x57   : > { %v297_v39 = vmax.f32 %v295_v35, %v296_v37  ;;  %v304_v40 = vmax.f32 %v302_v36, %v303_v38  ;;  %vm275_vm13 = vcmp.lt.s32.totalorder %v273_v63, %v274_v1  ;;  %vm285_vm14 = vcmp.lt.s32.totalorder %v283_v62, %v284_v0 }
  0x58   : > { %v276_v10 = vsel %vm275_vm13, %v273_v63, %v274_v1  ;;  %v286_v11 = vsel %vm285_vm14, %v283_v62, %v284_v0 }
  0x59   : > { %v298_v41 = vrot.slane %v297_v39, 2  ;;  %v305_v42 = vrot.slane %v304_v40, 2  ;;  %vm287_vm15 = vcmp.eq.s32.totalorder %v862_v20, %v276_v10  ;;  %vm288_vm0 = vcmp.eq.s32.totalorder %v862_v20, %v286_v11 }
  0x5b   : > { %v299_v43 = vmax.f32 %v297_v39, %v298_v41  ;;  %v306_v44 = vmax.f32 %v304_v40, %v305_v42 }
  0x5d   : > { %v300_v47 = vrot.slane %v299_v43, 1  ;;  %v307_v48 = vrot.slane %v306_v44, 1 }
  0x5f   : > { %v871_v49 = vmax.f32 %v306_v44, %v307_v48  ;;  %v873_v52 = vmax.f32 %v299_v43, %v300_v47 }
  0x61   : > { %v311_v53 = vrot.slane %v871_v49, 4 }
  0x63   : > { %v312_v54 = vsel %vm235_vm1, %v873_v52, %v311_v53 }
  0x64   : > { %v314_v55 = vsub.f32 %v227_v30, %v312_v54 }
  0x66   : > { %v315_v56 = vmul.f32 1.442695, %v314_v55 }
  0x68   : > { %597 = vpow2.f32 %v315_v56 }
  0x6e   : > { %v598_v61 = vpop.eup %597 }
  0x6f   : > { %318 = vst [vmem:[#allocation1] ss:$2 sm:$0xff] %v598_v61 }
  0x76   : > { %v319_v2 = vld.sshfl [vmem:[#allocation1] sm:$0xff pattern:$0x75316420]  ;;  %v320_v3 = vld.sshfl [vmem:[#allocation1 + $0x8] sm:$0xff pattern:$0x75316420] }
  0x77   : > { %343 = vst [vmem:[#allocation1] ss:$2 sm:$0xff] %v227_v30  ;;  %v323_v4 = vsel %vm235_vm1, %v319_v2, 0.0  ;;  %v330_v5 = vsel %vm235_vm1, %v320_v3, 0.0 }
  0x78   : > { %v324_v6 = vrot.slane %v323_v4, 4  ;;  %v331_v7 = vrot.slane %v330_v5, 4 }
  0x7a   : > { %v325_v8 = vadd.f32 %v324_v6, %v323_v4  ;;  %v332_v9 = vadd.f32 %v331_v7, %v330_v5 }
  0x7c   : > { %v326_v12 = vrot.slane %v325_v8, 2  ;;  %v333_v14 = vrot.slane %v332_v9, 2 }
  0x7e   : > { %v327_v15 = vadd.f32 %v326_v12, %v325_v8  ;;  %v334_v16 = vadd.f32 %v333_v14, %v332_v9  ;;  %v344_v17 = vld.sshfl [vmem:[#allocation1] sm:$0xff pattern:$0x75316420]  ;;  %v345_v18 = vld.sshfl [vmem:[#allocation1 + $0x8] sm:$0xff pattern:$0x75316420] }
  0x7f   : > { %v348_v19 = vsel %vm287_vm15, %v344_v17, 0.0  ;;  %v349_v21 = vsel %vm288_vm0, %v345_v18, 0.0 }
  0x80   : > { %v328_v22 = vrot.slane %v327_v15, 1  ;;  %v335_v23 = vrot.slane %v334_v16, 1  ;;  %v350_v24 = vsel %vm235_vm1, %v348_v19, 0.0  ;;  %v357_v25 = vsel %vm235_vm1, %v349_v21, 0.0 }
  0x81   : > { %v351_v26 = vrot.slane %v350_v24, 4  ;;  %v358_v27 = vrot.slane %v357_v25, 4  ;;  %vm369_vm1 = vcmask 1040384  }
  0x82   : > { %v329_v28 = vadd.f32 %v328_v22, %v327_v15  ;;  %v336_v29 = vadd.f32 %v335_v23, %v334_v16 }
  0x83   : > { %v352_v30 = vadd.f32 %v351_v26, %v350_v24  ;;  %v359_v20 = vadd.f32 %v358_v27, %v357_v25 }
  0x84   : > { %599 = vlog2.f32 %v329_v28 }
  0x85   : > { %601 = vlog2.f32 %v336_v29  ;;  %v353_v31 = vrot.slane %v352_v30, 2  ;;  %v360_v32 = vrot.slane %v359_v20, 2 }
  0x87   : > { %v361_v33 = vadd.f32 %v360_v32, %v359_v20  ;;  %v354_v34 = vadd.f32 %v353_v31, %v352_v30 }
  0x89   : > { %v362_v36 = vrot.slane %v361_v33, 1  ;;  %v355_v40 = vrot.slane %v354_v34, 1 }
  0x8a   : > { %v600_v35 = vpop.eup %599 }
  0x8b   : > { %v602_v37 = vpop.eup %601  ;;  %v338_v38 = vmul.f32 0.6931472, %v600_v35  ;;  %v363_v43 = vadd.f32 %v362_v36, %v361_v33  ;;  %v356_v44 = vadd.f32 %v355_v40, %v354_v34 }
  0x8c   : > { %v340_v39 = vmul.f32 0.6931472, %v602_v37 }
  0x8d   : > { %v341_v41 = vadd.f32 %v338_v38, %v873_v52 }
  0x8e   : > { %v342_v42 = vadd.f32 %v340_v39, %v871_v49 }
  0x8f   : > { %v364_v46 = vsub.f32 %v341_v41, %v356_v44 }
  0x90   : > { %v365_v45 = vsub.f32 %v342_v42, %v363_v43 }
  0x92   : > { %v368_v47 = vrot.slane %v365_v45, 7 }
  0x94   : > { %v370_v48 = vsel %vm369_vm1, %v364_v46, %v368_v47 }
  0x95   : > { %376 = vst.msk [vmem:[%s223_s7] sm:$0x3] %vm374_vm2, %v370_v48 }
  0x96   : > { %690 = shalt.err (!%p687_p13)
}
  0x97   : > { %533 = dma.vmem_to_hbm [thread:$0]  (%p818_p9), %s393_s8, 32, %s395_s12, %s378_s15  }
  0x98 PF: > { %s406_s19 = sand.u32 1, %s729_s9   ;;  %p543_p0 = pnand %p507_p12, %p825_p11 }
  0x99   : > { %s407_s25 = scalar_lea.sflag [#allocation4], %s406_s19 }
  0x9a   : > { %p544_p1 = pneg %p543_p0 }
  0x9c   : > { %724 = dma.done.wait (%p544_p1), %s407_s25, 32  }
  0x9d   : > { %726 = vsyncadd (%p544_p1), %s407_s25, 4294967264  ;;  %s21_s14 = sadd.s32 1, %s749_s14   ;;  %s933_s9 = smov %s733_s10 }
  0x9e   : > { %p18_p2 = scmp.ge.s32.totalorder %s21_s14, 4   ;;  %s934_s10 = smov %s737_s11 }
  0x9f   : > { %s935_s11 = smov %s823_s23  ;;  %s936_s12 = smov %s745_s13 }
  0xa0   : > { %s937_s13 = smov %s939_s17  ;;  %20 = sbr.rel (!%p18_p2) target bundleno = 8 (0x8), region = 86 }
  0xa5   :  { %413 = vsyncpa [#allocation3], 1 }
  0xa6   :  { %415 = vsyncpa [#allocation3 + $0x1], 1 }
  0xa7   :  { %416 = vsyncpa [#allocation6], 1 }
  0xa8   :  { %418 = vsyncpa [#allocation6 + $0x1], 1 }
  0xa9   :  { %419 = vsyncpa [#allocation4], 1 }
  0xaa   :  { %421 = vsyncpa [#allocation4 + $0x1], 1 }

</bundles_post_ra>
